<compile_context>
chip_gen: v6e
topology: v6e:2x2x1
jax: 0.10.0
libtpu: 0.0.40
codegen_flags: <defaults>
</compile_context>

<pallas_src>
import functools
import math

import jax
import jax.numpy as jnp
from jax.experimental import pallas as pl
from jax.experimental.pallas import tpu as pltpu


def _round_up(x, m):
    return -(-x // m) * m


def _const_spec(shape):
    """Constant-index (grid-invariant) block: fetched once, single-buffered."""
    zero = (0,) * len(shape)
    return pl.BlockSpec(shape, lambda *_: zero, pipeline_mode=pl.Buffered(1))


# ----------------------- kernel 1: fused QKV projection + head split -----------------------
def _qkv_proj_kernel(num_heads, head_dim, dim,
                     x_ref, w_ref, b_ref, q_ref, k_ref, v_ref):
    bf16 = jnp.bfloat16
    x = x_ref[0].astype(bf16)                                            # (TS, D)
    qkv = (jnp.dot(x, w_ref[...], preferred_element_type=jnp.float32)
           + b_ref[...]).astype(bf16)                                    # (TS, 3D)
    # Head split at write time (static lane slices) -> (B, H, S, hd) outputs;
    # removes the host-side reshape/transpose between the two kernels.
    for h in range(num_heads):
        lo = h * head_dim
        q_ref[0, h] = qkv[:, lo:lo + head_dim]
        k_ref[0, h] = qkv[:, dim + lo:dim + lo + head_dim]
        v_ref[0, h] = qkv[:, 2 * dim + lo:2 * dim + lo + head_dim]


# --------- kernel 2: flash attention + out-proj + LN1 + FFN + LN2 (post-norm) --------------
def _attn_ffn_kernel(num_heads, head_dim, eps,
                     x_ref, q_ref, k_ref, v_ref,
                     wo_ref, bo_ref, ln1w_ref, ln1b_ref,
                     w1_ref, b1_ref, w2_ref, b2_ref, ln2w_ref, ln2b_ref,
                     out_ref, m_sc, l_sc, acc_sc, omrg_sc):
    f32, bf16 = jnp.float32, jnp.bfloat16
    ki = pl.program_id(2)

    @pl.when(ki == 0)
    def _init():
        m_sc[...] = jnp.full_like(m_sc, -jnp.inf)
        l_sc[...] = jnp.zeros_like(l_sc)
        acc_sc[...] = jnp.zeros_like(acc_sc)

    q = q_ref[0]                         # (H, TQ, hd) bf16 (softmax scale folded in)
    k = k_ref[0]                         # (H, TK, hd) bf16
    v = v_ref[0]                         # (H, TK, hd) bf16

    # ---- online-softmax flash step: live scores are only (H, TQ, TK) ----
    s = jnp.einsum("hqd,hkd->hqk", q, k, preferred_element_type=f32)
    m_prev = m_sc[...]
    m_new = jnp.maximum(m_prev, jnp.max(s, axis=-1, keepdims=True))
    alpha = jnp.exp(m_prev - m_new)
    p = jnp.exp(s - m_new)               # unnormalized probs in [0, 1]
    l_sc[...] = alpha * l_sc[...] + jnp.sum(p, axis=-1, keepdims=True)
    acc_sc[...] = alpha * acc_sc[...] + jnp.einsum(
        "hqk,hkd->hqd", p.astype(bf16), v, preferred_element_type=f32)
    m_sc[...] = m_new

    @pl.when(ki == pl.num_programs(2) - 1)
    def _finalize():
        # Deferred normalization: scale the (H, TQ, hd) accumulator, not (H, TQ, S).
        o = (acc_sc[...] * (1.0 / l_sc[...])).astype(bf16)               # (H, TQ, hd)
        # TODO(synk): attention dropout (p=0.1) is identity in eval mode — skipped.

        # Merge heads into a lane-dense (TQ, D) scratch, then ONE full-depth matmul.
        for h in range(num_heads):
            omrg_sc[:, h * head_dim:(h + 1) * head_dim] = o[h]
        attn = jnp.dot(omrg_sc[...], wo_ref[...],
                       preferred_element_type=f32) + bo_ref[...]         # (TQ, D)

        # ---- residual + LayerNorm 1 (f32 stats) ----
        x = x_ref[0].astype(f32) + attn
        mu = jnp.mean(x, axis=-1, keepdims=True)
        var = jnp.mean(jnp.square(x - mu), axis=-1, keepdims=True)
        x = (x - mu) * jax.lax.rsqrt(var + eps) * ln1w_ref[...] + ln1b_ref[...]

        # ---- feed-forward (bf16 matmuls, f32 accumulation, bf16 hidden) ----
        h1 = jnp.dot(x.astype(bf16), w1_ref[...], preferred_element_type=f32)
        h1 = jnp.maximum(h1 + b1_ref[...], 0.0).astype(bf16)             # (TQ, 4D)
        # TODO(synk): FFN dropout (p=0.1) is identity in eval mode — skipped.
        ff = jnp.dot(h1, w2_ref[...], preferred_element_type=f32) + b2_ref[...]

        # ---- residual + LayerNorm 2 (f32 stats) ----
        x = x + ff
        mu = jnp.mean(x, axis=-1, keepdims=True)
        var = jnp.mean(jnp.square(x - mu), axis=-1, keepdims=True)
        x = (x - mu) * jax.lax.rsqrt(var + eps) * ln2w_ref[...] + ln2b_ref[...]

        out_ref[0] = x.astype(out_ref.dtype)


# ------------------------------------------- wrapper ---------------------------------------
def residual_attention_block(x, params, num_heads, eps=1e-5,
                             q_tile=256, kv_tile=256, s_tile=512):
    """x: (B, S, D) float32. params: f32 master weights from init_params."""
    B, S, D = x.shape
    assert D % num_heads == 0
    hd = D // num_heads
    bf16, f32 = jnp.bfloat16, jnp.float32

    TS = min(S, s_tile)
    TQ = min(S, q_tile)
    TK = min(S, kv_tile)
    assert S % TS == 0 and S % TQ == 0 and S % TK == 0, \
        "sequence length must divide the tile sizes"

    # ---- host-side weight prep (fold softmax scale into q, fuse QKV, bf16 for MXU) ----
    scale = 1.0 / math.sqrt(hd)
    w_qkv = jnp.concatenate(
        [params["w_q"] * scale, params["w_k"], params["w_v"]], axis=1).astype(bf16)
    b_qkv = jnp.concatenate(
        [params["b_q"] * scale, params["b_k"], params["b_v"]], axis=1).astype(f32)
    wo = params["w_out"].astype(bf16)
    bo = params["b_out"].astype(f32)
    w1, b1 = params["w1"].astype(bf16), params["b1"].astype(f32)
    w2, b2 = params["w2"].astype(bf16), params["b2"].astype(f32)
    ln1w, ln1b = params["ln1_w"].astype(f32), params["ln1_b"].astype(f32)
    ln2w, ln2b = params["ln2_w"].astype(f32), params["ln2_b"].astype(f32)

    def nbytes(shape, dt):
        return math.prod(shape) * jnp.dtype(dt).itemsize

    def padded(shape, dt):
        s = list(shape)
        s[-1] = _round_up(s[-1], 128)
        if len(s) >= 2:
            s[-2] = _round_up(s[-2], 8)
        return nbytes(s, dt)

    # ---- generation-aware VMEM budget (128 MiB on v5e/v6e, 64 MiB on v7x) ----
    try:
        vmem_cap = int(pltpu.get_tpu_info().vmem_capacity_bytes)
    except Exception:
        vmem_cap = 128 * 2 ** 20
    cap = min(int(0.75 * vmem_cap), 100 * 2 ** 20)

    resident = (2 * padded((TQ, D), f32)                       # x tile (double-buffered)
                + 2 * padded((num_heads, TQ, hd), bf16)        # q tile
                + 4 * padded((num_heads, TK, hd), bf16)        # k, v tiles (streamed)
                + padded((D, D), bf16)                         # Wo (single-buffered)
                + padded((D, 4 * D), bf16) + padded((4 * D, D), bf16)
                + 2 * padded((num_heads, TQ, 1), f32)          # m, l scratch
                + padded((num_heads, TQ, hd), f32)             # acc scratch
                + padded((TQ, D), bf16)                        # merged-head scratch
                + 2 * padded((TQ, D), f32))                    # out tile
    live = (padded((num_heads, TQ, TK), f32) + padded((num_heads, TQ, TK), bf16)
            + padded((TQ, 4 * D), f32) + padded((TQ, 4 * D), bf16)
            + 4 * padded((TQ, D), f32))
    vmem_limit = int(min(cap, max(resident + live + (8 << 20), 32 << 20)))

    # ---- kernel 1: fused QKV projection, head-major outputs ----
    q, k, v = pl.pallas_call(
        functools.partial(_qkv_proj_kernel, num_heads, hd, D),
        out_shape=[jax.ShapeDtypeStruct((B, num_heads, S, hd), bf16)] * 3,
        grid_spec=pltpu.PrefetchScalarGridSpec(
            num_scalar_prefetch=0,
            grid=(B, S // TS),
            in_specs=[
                pl.BlockSpec((1, TS, D), lambda b, si: (b, si, 0)),
                _const_spec((D, 3 * D)),
                _const_spec((1, 3 * D)),
            ],
            out_specs=[pl.BlockSpec((1, num_heads, TS, hd),
                                    lambda b, si: (b, 0, si, 0))] * 3,
        ),
        compiler_params=pltpu.CompilerParams(
            dimension_semantics=("parallel", "parallel"),
            vmem_limit_bytes=vmem_limit),
        cost_estimate=pl.CostEstimate(
            flops=6 * B * S * D * D, transcendentals=0,
            bytes_accessed=nbytes((B, S, D), f32) + 3 * nbytes((B, S, D), bf16)
                           + nbytes((D, 3 * D), bf16)),
    )(x, w_qkv, b_qkv)

    # ---- kernel 2: flash attention + out-proj + LN1 + FFN + LN2 ----
    out = pl.pallas_call(
        functools.partial(_attn_ffn_kernel, num_heads, hd, eps),
        out_shape=jax.ShapeDtypeStruct((B, S, D), x.dtype),
        grid_spec=pltpu.PrefetchScalarGridSpec(
            num_scalar_prefetch=0,
            grid=(B, S // TQ, S // TK),
            in_specs=[
                pl.BlockSpec((1, TQ, D), lambda b, qi, ki: (b, qi, 0)),                  # x
                pl.BlockSpec((1, num_heads, TQ, hd), lambda b, qi, ki: (b, 0, qi, 0)),   # q
                pl.BlockSpec((1, num_heads, TK, hd), lambda b, qi, ki: (b, 0, ki, 0)),   # k
                pl.BlockSpec((1, num_heads, TK, hd), lambda b, qi, ki: (b, 0, ki, 0)),   # v
                _const_spec((D, D)), _const_spec((1, D)),                                # Wo, bo
                _const_spec((1, D)), _const_spec((1, D)),                                # ln1
                _const_spec((D, 4 * D)), _const_spec((1, 4 * D)),                        # W1, b1
                _const_spec((4 * D, D)), _const_spec((1, D)),                            # W2, b2
                _const_spec((1, D)), _const_spec((1, D)),                                # ln2
            ],
            out_specs=pl.BlockSpec((1, TQ, D), lambda b, qi, ki: (b, qi, 0)),
            scratch_shapes=[
                pltpu.VMEM((num_heads, TQ, 1), f32),    # running max
                pltpu.VMEM((num_heads, TQ, 1), f32),    # running denom
                pltpu.VMEM((num_heads, TQ, hd), f32),   # output accumulator
                pltpu.VMEM((TQ, D), bf16),              # merged-head buffer
            ]),
        compiler_params=pltpu.CompilerParams(
            dimension_semantics=("parallel", "parallel", "arbitrary"),
            vmem_limit_bytes=vmem_limit),
        cost_estimate=pl.CostEstimate(
            flops=4 * B * S * S * D + 18 * B * S * D * D,
            transcendentals=B * num_heads * S * S,
            bytes_accessed=2 * nbytes((B, S, D), f32) + 3 * nbytes((B, S, D), bf16)
                           + nbytes((D, D), bf16) + 2 * nbytes((D, 4 * D), bf16)),
    )(x, q, k, v, wo, bo, ln1w, ln1b, w1, b1, w2, b2, ln2w, ln2b)
    return out


def init_params(key, dim):
    """Deterministic synthetic f32 parameters (shapes follow nn.MultiheadAttention /
    nn.Linear / nn.LayerNorm); linear weights stored pre-transposed so kernels
    compute x @ W. The in_proj weight/bias are stored split into q/k/v chunks."""
    ks = jax.random.split(key, 8)
    s = 0.02
    f32 = jnp.float32
    return {
        "w_q": jax.random.normal(ks[0], (dim, dim), f32) * s,
        "w_k": jax.random.normal(ks[1], (dim, dim), f32) * s,
        "w_v": jax.random.normal(ks[2], (dim, dim), f32) * s,
        "b_q": jax.random.normal(ks[3], (1, dim), f32) * s,
        "b_k": jax.random.normal(ks[4], (1, dim), f32) * s,
        "b_v": jnp.zeros((1, dim), f32),
        "w_out": jax.random.normal(ks[5], (dim, dim), f32) * s,      # out_proj.weight.T
        "b_out": jnp.zeros((1, dim), f32),
        "ln1_w": jnp.ones((1, dim), f32),
        "ln1_b": jnp.zeros((1, dim), f32),
        "w1": jax.random.normal(ks[6], (dim, 4 * dim), f32) * s,     # linear1.weight.T
        "b1": jnp.zeros((1, 4 * dim), f32),
        "w2": jax.random.normal(ks[7], (4 * dim, dim), f32) * s,     # linear2.weight.T
        "b2": jnp.zeros((1, dim), f32),
        "ln2_w": jnp.ones((1, dim), f32),
        "ln2_b": jnp.zeros((1, dim), f32),
    }


if __name__ == "__main__":
    # Small demo shapes (correctness only; realistic deployments should use
    # D a multiple of 128 and S a multiple of the 256-row tiles).
    B, S, D, H = 2, 8, 32, 4          # batch, seq, dim, heads (head_dim = 8)
    key = jax.random.PRNGKey(0)
    kx, kp = jax.random.split(key)
    x = jax.random.normal(kx, (B, S, D), jnp.float32)
    params = init_params(kp, D)

    out = residual_attention_block(x, params, num_heads=H)
    out = jax.block_until_ready(out)
    assert out.shape == (B, S, D)
    assert bool(jnp.all(jnp.isfinite(out)))
    print("KERNEL_OK")
</pallas_src>

<mosaic_0001>
module attributes {stable_mosaic.version = 11 : i64} {
  func.func @_qkv_proj_kernel(%arg0: i32, %arg1: i32, %arg2: memref<1x8x32xf32, #tpu.memory_space<vmem>>, %arg3: memref<32x96xbf16, #tpu.memory_space<vmem>>, %arg4: memref<1x96xf32, #tpu.memory_space<vmem>>, %arg5: memref<1x4x8x8xbf16, #tpu.memory_space<vmem>>, %arg6: memref<1x4x8x8xbf16, #tpu.memory_space<vmem>>, %arg7: memref<1x4x8x8xbf16, #tpu.memory_space<vmem>>) attributes {dimension_semantics = [#tpu.dimension_semantics<parallel>, #tpu.dimension_semantics<parallel>], iteration_bounds = array<i64: 2, 1>, scalar_prefetch = 0 : i64, scratch_operands = 0 : i64, tpu.core_type = #tpu.core_type<tc>, window_params = [{transform_indices = @transform_0, window_bounds = array<i64: 1, 8, 32>}, {pipeline_mode = #tpu.pipeline_mode<synchronous>, transform_indices = @transform_1, window_bounds = array<i64: 32, 96>}, {pipeline_mode = #tpu.pipeline_mode<synchronous>, transform_indices = @transform_2, window_bounds = array<i64: 1, 96>}, {transform_indices = @transform_3, window_bounds = array<i64: 1, 4, 8, 8>}, {transform_indices = @transform_4, window_bounds = array<i64: 1, 4, 8, 8>}, {transform_indices = @transform_5, window_bounds = array<i64: 1, 4, 8, 8>}]} {
    %c0 = arith.constant 0 : index
    %c0_0 = arith.constant 0 : index
    %c0_1 = arith.constant 0 : index
    %0 = vector.load %arg2[%c0, %c0_0, %c0_1] : memref<1x8x32xf32, #tpu.memory_space<vmem>>, vector<1x8x32xf32>
    %1 = vector.shape_cast %0 : vector<1x8x32xf32> to vector<8x32xf32>
    %2 = arith.truncf %1 : vector<8x32xf32> to vector<8x32xbf16>
    %c0_2 = arith.constant 0 : index
    %c0_3 = arith.constant 0 : index
    %3 = vector.load %arg3[%c0_2, %c0_3] : memref<32x96xbf16, #tpu.memory_space<vmem>>, vector<32x96xbf16>
    %cst = arith.constant dense<0.000000e+00> : vector<8x96xf32>
    %4 = tpu.matmul %2, %3, %cst {dimension_numbers = #tpu.dot_dimension_numbers<[1], [0], [0], [1], [0, 0, 1, 1], [], []>} : vector<8x32xbf16>, vector<32x96xbf16>, vector<8x96xf32> -> vector<8x96xf32>
    %c0_4 = arith.constant 0 : index
    %c0_5 = arith.constant 0 : index
    %5 = vector.load %arg4[%c0_4, %c0_5] : memref<1x96xf32, #tpu.memory_space<vmem>>, vector<1x96xf32>
    %6 = vector.broadcast %5 : vector<1x96xf32> to vector<8x96xf32>
    %7 = arith.addf %4, %6 : vector<8x96xf32>
    %8 = arith.truncf %7 : vector<8x96xf32> to vector<8x96xbf16>
    %9 = vector.extract_strided_slice %8 {offsets = [0, 0], sizes = [8, 8], strides = [1, 1]} : vector<8x96xbf16> to vector<8x8xbf16>
    %c0_6 = arith.constant 0 : index
    %c0_7 = arith.constant 0 : index
    %c0_8 = arith.constant 0 : index
    %c0_9 = arith.constant 0 : index
    %10 = vector.load %arg5[%c0_6, %c0_7, %c0_8, %c0_9] : memref<1x4x8x8xbf16, #tpu.memory_space<vmem>>, vector<1x1x8x8xbf16>
    %11 = vector.shape_cast %10 : vector<1x1x8x8xbf16> to vector<8x8xbf16>
    %12 = vector.shape_cast %9 : vector<8x8xbf16> to vector<1x1x8x8xbf16>
    tpu.vector_store %arg5[%c0_6, %c0_7, %c0_8, %c0_9], %12 {strides = array<i32>} : memref<1x4x8x8xbf16, #tpu.memory_space<vmem>>, vector<1x1x8x8xbf16>,
    %13 = vector.extract_strided_slice %8 {offsets = [0, 32], sizes = [8, 8], strides = [1, 1]} : vector<8x96xbf16> to vector<8x8xbf16>
    %c0_10 = arith.constant 0 : index
    %c0_11 = arith.constant 0 : index
    %c0_12 = arith.constant 0 : index
    %c0_13 = arith.constant 0 : index
    %14 = vector.load %arg6[%c0_10, %c0_11, %c0_12, %c0_13] : memref<1x4x8x8xbf16, #tpu.memory_space<vmem>>, vector<1x1x8x8xbf16>
    %15 = vector.shape_cast %14 : vector<1x1x8x8xbf16> to vector<8x8xbf16>
    %16 = vector.shape_cast %13 : vector<8x8xbf16> to vector<1x1x8x8xbf16>
    tpu.vector_store %arg6[%c0_10, %c0_11, %c0_12, %c0_13], %16 {strides = array<i32>} : memref<1x4x8x8xbf16, #tpu.memory_space<vmem>>, vector<1x1x8x8xbf16>,
    %17 = vector.extract_strided_slice %8 {offsets = [0, 64], sizes = [8, 8], strides = [1, 1]} : vector<8x96xbf16> to vector<8x8xbf16>
    %c0_14 = arith.constant 0 : index
    %c0_15 = arith.constant 0 : index
    %c0_16 = arith.constant 0 : index
    %c0_17 = arith.constant 0 : index
    %18 = vector.load %arg7[%c0_14, %c0_15, %c0_16, %c0_17] : memref<1x4x8x8xbf16, #tpu.memory_space<vmem>>, vector<1x1x8x8xbf16>
    %19 = vector.shape_cast %18 : vector<1x1x8x8xbf16> to vector<8x8xbf16>
    %20 = vector.shape_cast %17 : vector<8x8xbf16> to vector<1x1x8x8xbf16>
    tpu.vector_store %arg7[%c0_14, %c0_15, %c0_16, %c0_17], %20 {strides = array<i32>} : memref<1x4x8x8xbf16, #tpu.memory_space<vmem>>, vector<1x1x8x8xbf16>,
    %21 = vector.extract_strided_slice %8 {offsets = [0, 8], sizes = [8, 8], strides = [1, 1]} : vector<8x96xbf16> to vector<8x8xbf16>
    %c0_18 = arith.constant 0 : index
    %c1 = arith.constant 1 : index
    %c0_19 = arith.constant 0 : index
    %c0_20 = arith.constant 0 : index
    %22 = vector.load %arg5[%c0_18, %c1, %c0_19, %c0_20] : memref<1x4x8x8xbf16, #tpu.memory_space<vmem>>, vector<1x1x8x8xbf16>
    %23 = vector.shape_cast %22 : vector<1x1x8x8xbf16> to vector<8x8xbf16>
    %24 = vector.shape_cast %21 : vector<8x8xbf16> to vector<1x1x8x8xbf16>
    tpu.vector_store %arg5[%c0_18, %c1, %c0_19, %c0_20], %24 {strides = array<i32>} : memref<1x4x8x8xbf16, #tpu.memory_space<vmem>>, vector<1x1x8x8xbf16>,
    %25 = vector.extract_strided_slice %8 {offsets = [0, 40], sizes = [8, 8], strides = [1, 1]} : vector<8x96xbf16> to vector<8x8xbf16>
    %c0_21 = arith.constant 0 : index
    %c1_22 = arith.constant 1 : index
    %c0_23 = arith.constant 0 : index
    %c0_24 = arith.constant 0 : index
    %26 = vector.load %arg6[%c0_21, %c1_22, %c0_23, %c0_24] : memref<1x4x8x8xbf16, #tpu.memory_space<vmem>>, vector<1x1x8x8xbf16>
    %27 = vector.shape_cast %26 : vector<1x1x8x8xbf16> to vector<8x8xbf16>
    %28 = vector.shape_cast %25 : vector<8x8xbf16> to vector<1x1x8x8xbf16>
    tpu.vector_store %arg6[%c0_21, %c1_22, %c0_23, %c0_24], %28 {strides = array<i32>} : memref<1x4x8x8xbf16, #tpu.memory_space<vmem>>, vector<1x1x8x8xbf16>,
    %29 = vector.extract_strided_slice %8 {offsets = [0, 72], sizes = [8, 8], strides = [1, 1]} : vector<8x96xbf16> to vector<8x8xbf16>
    %c0_25 = arith.constant 0 : index
    %c1_26 = arith.constant 1 : index
    %c0_27 = arith.constant 0 : index
    %c0_28 = arith.constant 0 : index
    %30 = vector.load %arg7[%c0_25, %c1_26, %c0_27, %c0_28] : memref<1x4x8x8xbf16, #tpu.memory_space<vmem>>, vector<1x1x8x8xbf16>
    %31 = vector.shape_cast %30 : vector<1x1x8x8xbf16> to vector<8x8xbf16>
    %32 = vector.shape_cast %29 : vector<8x8xbf16> to vector<1x1x8x8xbf16>
    tpu.vector_store %arg7[%c0_25, %c1_26, %c0_27, %c0_28], %32 {strides = array<i32>} : memref<1x4x8x8xbf16, #tpu.memory_space<vmem>>, vector<1x1x8x8xbf16>,
    %33 = vector.extract_strided_slice %8 {offsets = [0, 16], sizes = [8, 8], strides = [1, 1]} : vector<8x96xbf16> to vector<8x8xbf16>
    %c0_29 = arith.constant 0 : index
    %c2 = arith.constant 2 : index
    %c0_30 = arith.constant 0 : index
    %c0_31 = arith.constant 0 : index
    %34 = vector.load %arg5[%c0_29, %c2, %c0_30, %c0_31] : memref<1x4x8x8xbf16, #tpu.memory_space<vmem>>, vector<1x1x8x8xbf16>
    %35 = vector.shape_cast %34 : vector<1x1x8x8xbf16> to vector<8x8xbf16>
    %36 = vector.shape_cast %33 : vector<8x8xbf16> to vector<1x1x8x8xbf16>
    tpu.vector_store %arg5[%c0_29, %c2, %c0_30, %c0_31], %36 {strides = array<i32>} : memref<1x4x8x8xbf16, #tpu.memory_space<vmem>>, vector<1x1x8x8xbf16>,
    %37 = vector.extract_strided_slice %8 {offsets = [0, 48], sizes = [8, 8], strides = [1, 1]} : vector<8x96xbf16> to vector<8x8xbf16>
    %c0_32 = arith.constant 0 : index
    %c2_33 = arith.constant 2 : index
    %c0_34 = arith.constant 0 : index
    %c0_35 = arith.constant 0 : index
    %38 = vector.load %arg6[%c0_32, %c2_33, %c0_34, %c0_35] : memref<1x4x8x8xbf16, #tpu.memory_space<vmem>>, vector<1x1x8x8xbf16>
    %39 = vector.shape_cast %38 : vector<1x1x8x8xbf16> to vector<8x8xbf16>
    %40 = vector.shape_cast %37 : vector<8x8xbf16> to vector<1x1x8x8xbf16>
    tpu.vector_store %arg6[%c0_32, %c2_33, %c0_34, %c0_35], %40 {strides = array<i32>} : memref<1x4x8x8xbf16, #tpu.memory_space<vmem>>, vector<1x1x8x8xbf16>,
    %41 = vector.extract_strided_slice %8 {offsets = [0, 80], sizes = [8, 8], strides = [1, 1]} : vector<8x96xbf16> to vector<8x8xbf16>
    %c0_36 = arith.constant 0 : index
    %c2_37 = arith.constant 2 : index
    %c0_38 = arith.constant 0 : index
    %c0_39 = arith.constant 0 : index
    %42 = vector.load %arg7[%c0_36, %c2_37, %c0_38, %c0_39] : memref<1x4x8x8xbf16, #tpu.memory_space<vmem>>, vector<1x1x8x8xbf16>
    %43 = vector.shape_cast %42 : vector<1x1x8x8xbf16> to vector<8x8xbf16>
    %44 = vector.shape_cast %41 : vector<8x8xbf16> to vector<1x1x8x8xbf16>
    tpu.vector_store %arg7[%c0_36, %c2_37, %c0_38, %c0_39], %44 {strides = array<i32>} : memref<1x4x8x8xbf16, #tpu.memory_space<vmem>>, vector<1x1x8x8xbf16>,
    %45 = vector.extract_strided_slice %8 {offsets = [0, 24], sizes = [8, 8], strides = [1, 1]} : vector<8x96xbf16> to vector<8x8xbf16>
    %c0_40 = arith.constant 0 : index
    %c3 = arith.constant 3 : index
    %c0_41 = arith.constant 0 : index
    %c0_42 = arith.constant 0 : index
    %46 = vector.load %arg5[%c0_40, %c3, %c0_41, %c0_42] : memref<1x4x8x8xbf16, #tpu.memory_space<vmem>>, vector<1x1x8x8xbf16>
    %47 = vector.shape_cast %46 : vector<1x1x8x8xbf16> to vector<8x8xbf16>
    %48 = vector.shape_cast %45 : vector<8x8xbf16> to vector<1x1x8x8xbf16>
    tpu.vector_store %arg5[%c0_40, %c3, %c0_41, %c0_42], %48 {strides = array<i32>} : memref<1x4x8x8xbf16, #tpu.memory_space<vmem>>, vector<1x1x8x8xbf16>,
    %49 = vector.extract_strided_slice %8 {offsets = [0, 56], sizes = [8, 8], strides = [1, 1]} : vector<8x96xbf16> to vector<8x8xbf16>
    %c0_43 = arith.constant 0 : index
    %c3_44 = arith.constant 3 : index
    %c0_45 = arith.constant 0 : index
    %c0_46 = arith.constant 0 : index
    %50 = vector.load %arg6[%c0_43, %c3_44, %c0_45, %c0_46] : memref<1x4x8x8xbf16, #tpu.memory_space<vmem>>, vector<1x1x8x8xbf16>
    %51 = vector.shape_cast %50 : vector<1x1x8x8xbf16> to vector<8x8xbf16>
    %52 = vector.shape_cast %49 : vector<8x8xbf16> to vector<1x1x8x8xbf16>
    tpu.vector_store %arg6[%c0_43, %c3_44, %c0_45, %c0_46], %52 {strides = array<i32>} : memref<1x4x8x8xbf16, #tpu.memory_space<vmem>>, vector<1x1x8x8xbf16>,
    %53 = vector.extract_strided_slice %8 {offsets = [0, 88], sizes = [8, 8], strides = [1, 1]} : vector<8x96xbf16> to vector<8x8xbf16>
    %c0_47 = arith.constant 0 : index
    %c3_48 = arith.constant 3 : index
    %c0_49 = arith.constant 0 : index
    %c0_50 = arith.constant 0 : index
    %54 = vector.load %arg7[%c0_47, %c3_48, %c0_49, %c0_50] : memref<1x4x8x8xbf16, #tpu.memory_space<vmem>>, vector<1x1x8x8xbf16>
    %55 = vector.shape_cast %54 : vector<1x1x8x8xbf16> to vector<8x8xbf16>
    %56 = vector.shape_cast %53 : vector<8x8xbf16> to vector<1x1x8x8xbf16>
    tpu.vector_store %arg7[%c0_47, %c3_48, %c0_49, %c0_50], %56 {strides = array<i32>} : memref<1x4x8x8xbf16, #tpu.memory_space<vmem>>, vector<1x1x8x8xbf16>,
    return
  }
  func.func @transform_0(%arg0: i32, %arg1: i32) -> (i32, i32, i32) {
    %c0_i32 = arith.constant 0 : i32
    %c0_i32_0 = arith.constant 0 : i32
    return %arg0, %arg1, %c0_i32 : i32, i32, i32
  }
  func.func @transform_1(%arg0: i32, %arg1: i32) -> (i32, i32) {
    %c0_i32 = arith.constant 0 : i32
    %c0_i32_0 = arith.constant 0 : i32
    %c0_i32_1 = arith.constant 0 : i32
    return %c0_i32, %c0_i32_0 : i32, i32
  }
  func.func @transform_2(%arg0: i32, %arg1: i32) -> (i32, i32) {
    %c0_i32 = arith.constant 0 : i32
    %c0_i32_0 = arith.constant 0 : i32
    %c0_i32_1 = arith.constant 0 : i32
    return %c0_i32, %c0_i32_0 : i32, i32
  }
  func.func @transform_3(%arg0: i32, %arg1: i32) -> (i32, i32, i32, i32) {
    %c0_i32 = arith.constant 0 : i32
    %c0_i32_0 = arith.constant 0 : i32
    %c0_i32_1 = arith.constant 0 : i32
    return %arg0, %c0_i32, %arg1, %c0_i32_0 : i32, i32, i32, i32
  }
  func.func @transform_4(%arg0: i32, %arg1: i32) -> (i32, i32, i32, i32) {
    %c0_i32 = arith.constant 0 : i32
    %c0_i32_0 = arith.constant 0 : i32
    %c0_i32_1 = arith.constant 0 : i32
    return %arg0, %c0_i32, %arg1, %c0_i32_0 : i32, i32, i32, i32
  }
  func.func @transform_5(%arg0: i32, %arg1: i32) -> (i32, i32, i32, i32) {
    %c0_i32 = arith.constant 0 : i32
    %c0_i32_0 = arith.constant 0 : i32
    %c0_i32_1 = arith.constant 0 : i32
    return %arg0, %c0_i32, %arg1, %c0_i32_0 : i32, i32, i32, i32
  }
}

</mosaic_0001>

<bundles_post_ra>
// kernel: tpu_custom_call.1
= control target key start
LH: loop header
LB: loop body
LE: loop exit
PB: predicated region body
PF: predicated region fallthrough
CT: control target
= control target key end

     0   :  { %s1332_s0 = inlined_call_operand.hbm [shape: f32[2,8,32], index: 0, kind: input, shape index: {}]   ;;  %s1333_s1 = inlined_call_operand.hbm [shape: bf16[32,96], index: 1, kind: input, shape index: {}]   ;;  %s1334_s2 = inlined_call_operand.vmem [shape: f32[1,96], index: 2, kind: input, shape index: {}]   ;;  %s1335_s3 = inlined_call_operand.hbm [shape: bf16[2,4,8,8], index: 3, kind: output, shape index: {0}]   ;;  %s1336_s4 = inlined_call_operand.hbm [shape: bf16[2,4,8,8], index: 4, kind: output, shape index: {1}]   ;;  %s1337_s5 = inlined_call_operand.hbm [shape: bf16[2,4,8,8], index: 5, kind: output, shape index: {2}]  }
   0x1   :  { %1341 = sst [smem:[#allocation16_spill]] %s1333_s1 }
   0x2   :  { %11 = vsyncpa [#allocation3], 0 }
   0x3   :  { %13 = vsyncpa [#allocation3 + $0x1], 0 }
   0x4   :  { %14 = vsyncpa [#allocation6], 0 }
   0x5   :  { %15 = vsyncpa [#allocation4], 0 }
   0x6   :  { %17 = vsyncpa [#allocation4 + $0x1], 0 }
   0x7   :  { %18 = vsyncpa [#allocation9], 0 }
   0x8   :  { %20 = vsyncpa [#allocation9 + $0x1], 0  ;;  %s1042_s18 = smov 0   ;;  %s1044_s19 = smov 0  }
   0x9   :  { %s1046_s20 = smov 0   ;;  %s1048_s21 = smov 0  }
   0xa   :  { %s1050_s22 = smov 0   ;;  %s1052_s23 = smov 0  }
   0xb LB: > { %s1073_s24 = sadd.s32 4294967295, %s989_s23   ;;  %s1338_s25 = sadd.s32 4294967294, %s989_s23   ;;  %s989_s23 = sphi %s1052_s23, %s26_s23   ;;  %s985_s22 = sphi %s1050_s22, %s1362_s22   ;;  %s981_s21 = sphi %s1048_s21, %s1361_s21   ;;  %s977_s20 = sphi %s1046_s20, %s1360_s20   ;;  %s973_s19 = sphi %s1044_s19, %s1359_s19   ;;  %s969_s18 = sphi %s1042_s18, %s1358_s18  }
   0xc   : > { %p60_p0 = scmp.ne.s32.totalorder %s973_s19, %s969_s18  ;;  %p1340_p1 = scmp.eq.s32.totalorder %s1073_s24, 0 }
   0xd   : > { %p134_p3 = scmp.eq.s32.totalorder %s1338_s25, 1  ;;  %p643_p5 = scmp.ge.s32.totalorder %s989_s23, 1 }
   0xe   : > { %p1084_p4 = por %p1340_p1, %p60_p0  ;;  %p197_p7 = scmp.lt.s32.totalorder %s989_s23, 3 }
   0xf   : > { %p1089_p6 = por %p134_p3, %p60_p0  ;;  %s991_s29 = smov [#allocation5]  }
  0x10   : > { %p1094_p8 = pnand %p643_p5, %p197_p7  ;;  %s209_s30 = sshll.u32 %s991_s29, 4  ;;  %s210_s30 = int_to_ptr.vmem [resolvable:$true] %s209_s30 }
  0x11   : > { %s1343_s27 = scalar_select %p1089_p6, 1, 0 }
  0x12   : > { %p706_p9 = pneg %p1094_p8  ;;  %s38_s7 = sadd.s32 1, %s985_s22 }
  0x13   : > { %s806_s8 = scalar_lea.vmem %s210_s30, 256  ;;  %p814_p5 = scmp.lt.s32.totalorder %s210_s30, %s210_s30 }
  0x14   : > { %p1103_p11 = pnand %p706_p9, %p1340_p1  ;;  %p807_p13 = scmp.ne.s32.totalorder %s210_s30, %s806_s8 }
  0x15   : > { %p815_p7 = scmp.lt.s32.totalorder %s806_s8, %s806_s8 }
  0x16   : > { %p797_p12 = pneg %p1103_p11 }
  0x17   : > { %p816_p2 = por %p815_p7, %p814_p5 }
  0x18   : > { %p809_p0 = pnand %p807_p13, %p797_p12 }
  0x1a   : > { %p810_p3 = pneg %p809_p0 }
  0x1c   : > { %p817_p6 = pnand %p816_p2, %p810_p3 }
  0x1e   : > { %820 = shalt.err (!%p817_p6)
}
  0x1f   : > { %s992_s9 = smov 64   ;;  %s993_s10 = smov 4  }
  0x20   : > { %s1346_s1 = sld [smem:[#allocation16_spill]]  ;;  %p40_p2 = scmp.ge.s32.totalorder %s38_s7, 2 }
  0x21   : > { %s47_s13 = sadd.s32 1, %s977_s20  ;;  %p54_p6 = scmp.ne.s32.totalorder %s977_s20, %s973_s19 }
  0x22   : > { %p55_p9 = scmp.eq.s32.totalorder %s989_s23, 0  ;;  %s1364_s7 = smov (%p40_p2, %s38_s7), 0 }
  0x23   : > { %1347 = sst [smem:[#allocation15_spill]] %s1364_s7  ;;  %p1349_p13 = scmp.eq.s32.totalorder %s1073_s24, 1 }
  0x24   : > { %p1121_p12 = por %p55_p9, %p54_p6  ;;  %s42_s16 = ssub.s32 %s985_s22, %s1364_s7 }
  0x25   : > { %p1127_p0 = por %p1349_p13, %p54_p6  ;;  %p725_p3 = scmp.lt.s32.totalorder %s989_s23, 2 }
  0x26   : > { %709 = dma.hbm_to_vmem [thread:$0]  (!%p1103_p11), %s1346_s1, 256, %s210_s30, [#allocation6], %s992_s9, %s992_s9, %s993_s10  }
  0x27   : > { %p45_p11 = scmp.eq.s32.totalorder %s42_s16, 0  ;;  %s226_s17 = sand.u32 1, %s977_s20  }
  0x28   : > { %s646_s29 = sshll.u32 %s226_s17, 3  ;;  %s647_s6 = sshll.u32 %s985_s22, 7 }
  0x29   : > { %s1136_s30 = scalar_select %p45_p11, %s977_s20, %s47_s13  }
  0x2a   : > { %s236_s10 = scalar_lea.hbm %s1332_s0, %s647_s6  ;;  %s230_s11 = scalar_lea.vmem [#allocation2], %s646_s29 }
  0x2b   : > { %s238_s12 = sshll.u32 %s230_s11, 4  ;;  %p1144_p5 = pnand %p725_p3, %p1121_p12  ;;  %s239_s12 = int_to_ptr.vmem [resolvable:$true] %s238_s12 }
  0x2c   : > { %s227_s1 = scalar_lea.sflag [#allocation3], %s226_s17  ;;  %s834_s16 = scalar_lea.vmem %s239_s12, 128 }
  0x2d   : > { %p823_p7 = pneg %p1144_p5  ;;  %p835_p2 = scmp.ne.s32.totalorder %s239_s12, %s834_s16 }
  0x2e   : > { %s994_s13 = smov [#allocation2]  }
  0x2f   : > { %p837_p6 = pnand %p835_p2, %p823_p7  ;;  %s839_s7 = sshll.u32 %s994_s13, 4  ;;  %s840_s7 = int_to_ptr.vmem [resolvable:$false] %s839_s7 }
  0x30   : > { %s841_s6 = scalar_lea.vmem %s840_s7, 256  ;;  %p842_p13 = scmp.lt.s32.totalorder %s239_s12, %s840_s7 }
  0x31   : > { %p838_p9 = pneg %p837_p6  ;;  %p843_p11 = scmp.lt.s32.totalorder %s841_s6, %s834_s16 }
  0x33   : > { %p844_p10 = por %p843_p11, %p842_p13 }
  0x35   : > { %p845_p1 = pnand %p844_p10, %p838_p9 }
  0x37   : > { %848 = shalt.err (!%p845_p1)
}
  0x38   : > { %713 = dma.hbm_to_vmem [thread:$0]  (!%p1144_p5), %s236_s10, 128, %s239_s12, %s227_s1  }
  0x39   : > { %247 = sbr.rel (%p1094_p8) target bundleno = 450 (0x1c2), region = 32  ;;  %s1155_s14 = sand.u32 (!%p1094_p8), 1, %s973_s19  }
  0x3a   : > { %s649_s17 = sshll.u32 (!%p1094_p8), %s1155_s14, 3  ;;  %s250_s29 = scalar_lea.sflag (!%p1094_p8), [#allocation3], %s1155_s14 }
  0x3b   : > { %s253_s8 = scalar_lea.vmem (!%p1094_p8), [#allocation2], %s649_s17 }
  0x3e   : > { %952 = dma.done.wait (%p1084_p4), %s250_s29, 128  }
  0x3f   : > { %954 = vsyncadd (%p1084_p4), %s250_s29, 4294967168  ;;  %p1352_p1 = scmp.eq.s32.totalorder %s1073_s24, 0 }
  0x41   : > { %956 = dma.done.wait (%p1352_p1), [#allocation6], 256   ;;  %p1353_p10 = pmov %p1352_p1 }
  0x42   : > { %v995_v0 = vmov 0.0   ;;  %vm996_vm0 = vmmov 0   ;;  %v793_v1 = vld [vmem:[#allocation5 + $0x8] sm:$0xff]   ;;  %v794_v2 = vld [vmem:[#allocation5] sm:$0xff]   ;;  %v295_v3 = vld [vmem:[%s253_s8] sm:$0xff]  ;;  %vm320_vm1 = vcmask 261120  }
  0x43   : > { %958 = vsyncadd (%p1353_p10), [#allocation6], 4294967040  ;;  %686 = vmatprep.subr.bf16.mxu0 %v995_v0  ;;  %690 = vmatprep.mubr.msk.bf16.mxu0 %vm996_vm0, %v995_v0  ;;  %v296_v4 = vpack.c.bf16 %v295_v3, %v295_v3  ;;  %v654_v5 = vld [vmem:[%s1334_s2] ss:$0 sm:$0xff]  ;;  %s1171_s26 = sshll.u32 %s1155_s14, 4  ;;  %vm365_vm2 = vcmask 60416  }
  0x44   : > { %687 = vmatpush3.bf16.msra.mxu0 %v793_v1  ;;  %s997_s28 = smov 80   ;;  %s998_s7 = smov 96  }
  0x45   : > { %688 = vmatprep.subr.bf16.mxu0 %v995_v0  ;;  %s1174_s9 = scalar_lea.vmem [#allocation7], %s1171_s26  ;;  %s999_s10 = smov 72  }
  0x46   : > { %s1000_s11 = smov 88   ;;  %s1001_s12 = smov 120  }
  0x47   : > { %s1002_s16 = smov 64   ;;  %s1003_s13 = smov 112  }
  0x48   : > { %689 = vmatpush3.bf16.msra.mxu0 %v794_v2  ;;  %s1004_s6 = smov 56   ;;  %s1005_s17 = smov 104  }
  0x49   : > { %s1006_s29 = smov 48   ;;  %s1007_s8 = smov 40  }
  0x4a   : > { %s286_s1 = scalar_lea.vmem [#allocation8], %s1171_s26 }
  0x4b   : > { %691 = vmatmul.mubr.msk.bf16.vlgmr.msra.gmra.mxu0 %vm320_vm1, %v296_v4  ;;  %s465_s25 = sshll.u32 %s286_s1, 4  ;;  %s1186_s25 = int_to_ptr.vmem [resolvable:$true] %s465_s25 }
 0x10b   : > { %v358_v6 = vpop.f32.mrf.mxu0 }
 0x10c   : > { %v359_v7 = vadd.f32 %v654_v5, %v358_v6 }
 0x10d   : > { %v692_v8 = vpop.f32.mrf.mxu0 }
 0x10e   : > { %v364_v9 = vpack.c.bf16 %v359_v7, %v359_v7 }
 0x10f   : > { %v361_v10 = vpop.f32.mrf.mxu0 }
 0x110   : > { %398 = vrot.lane.b32.xlu1 %v364_v9, %s997_s28  ;;  %370 = vrot.lane.b32.xlu0 %v364_v9, %s998_s7  ;;  %366 = vst.msk [vmem:[%s1174_s9] sm:$0xf] %vm365_vm2, %v364_v9  ;;  %s428_s28 = sand.u32 1, %s1073_s24   ;;  %s1182_s7 = sshll.u32 %s981_s21, 8 }
 0x111   : > { %v693_v11 = vpop.f32.mrf.mxu0  ;;  %s1196_s21 = scalar_lea.sflag [#allocation9], %s428_s28  ;;  %s849_s24 = scalar_lea.vmem %s1186_s25, 256 }
 0x112   : > { %p850_p4 = scmp.ne.s32.totalorder %s1186_s25, %s849_s24 }
 0x114   : > { %413 = vrot.lane.b32.xlu1 %v364_v9, %s999_s10  ;;  %383 = vrot.lane.b32.xlu0 %v364_v9, %s1000_s11  ;;  %p851_p8 = pnand %p850_p4, %p1127_p0 }
 0x116   : > { %p852_p12 = pneg %p851_p8 }
 0x118   : > { %378 = vrot.lane.b32.xlu1 %v364_v9, %s1001_s12  ;;  %374 = vrot.lane.b32.xlu0 %v364_v9, %s1002_s16  ;;  %s1192_s12 = scalar_lea.hbm %s1336_s4, %s1182_s7 }
 0x11c   : > { %393 = vrot.lane.b32.xlu1 %v364_v9, %s1003_s13  ;;  %388 = vrot.lane.b32.xlu0 %v364_v9, %s1004_s6  ;;  %s1008_s13 = smov [#allocation8]  }
 0x11d   : > { %s853_s6 = sshll.u32 %s1008_s13, 4  ;;  %s854_s6 = int_to_ptr.vmem [resolvable:$false] %s853_s6 }
 0x11e   : > { %p856_p3 = scmp.lt.s32.totalorder %s1186_s25, %s854_s6 }
 0x120   : > { %408 = vrot.lane.b32.xlu1 %v364_v9, %s1005_s17  ;;  %403 = vrot.lane.b32.xlu0 %v364_v9, %s1006_s29  ;;  %s855_s17 = scalar_lea.vmem %s854_s6, 512 }
 0x121   : > { %p857_p5 = scmp.lt.s32.totalorder %s855_s17, %s849_s24 }
 0x123   : > { %p858_p7 = por %p857_p5, %p856_p3 }
 0x124   : > { %418 = vrot.lane.b32.xlu0 %v364_v9, %s1007_s8 }
 0x125   : > { %p859_p2 = pnand %p858_p7, %p852_p12 }
 0x182   : > { %v399_v12 = vpop.permute.xlu1 %398  ;;  %v371_v13 = vpop.permute.xlu0 %370 }
 0x183   : > { %663 = vst.msk [vmem:[%s286_s1 + $0x8] sm:$0xf] %vm365_vm2, %v399_v12  ;;  %373 = vst.msk [vmem:[%s286_s1] sm:$0xf] %vm365_vm2, %v371_v13 }
 0x186   : > { %v414_v14 = vpop.permute.xlu1 %413  ;;  %v384_v15 = vpop.permute.xlu0 %383 }
 0x187   : > { %666 = vst.msk [vmem:[%s286_s1 + $0xc] sm:$0xf] %vm365_vm2, %v414_v14  ;;  %660 = vst.msk [vmem:[%s286_s1 + $0x4] sm:$0xf] %vm365_vm2, %v384_v15 }
 0x188   : > { %862 = shalt.err (!%p859_p2)
}
 0x189   : > { %s863_s29 = scalar_lea.hbm %s1192_s12, 256  ;;  %s867_s28 = scalar_lea.hbm %s1336_s4, 512 }
 0x18a   : > { %p864_p6 = scmp.ne.s32.totalorder %s1192_s12, %s863_s29  ;;  %p868_p11 = scmp.lt.s32.totalorder %s1192_s12, %s1336_s4 }
 0x18b   : > { %p869_p1 = scmp.lt.s32.totalorder %s867_s28, %s863_s29 }
 0x18c   : > { %p865_p9 = pnand %p864_p6, %p1127_p0 }
 0x18d   : > { %p870_p10 = por %p869_p1, %p868_p11 }
 0x18e   : > { %p866_p13 = pneg %p865_p9 }
 0x190   : > { %p871_p4 = pnand %p870_p10, %p866_p13 }
 0x192   : > { %874 = shalt.err (!%p871_p4)
}
 0x193   : > { %s1009_s24 = smov 4   ;;  %v379_v16 = vpop.permute.xlu1 %378  ;;  %v375_v17 = vpop.permute.xlu0 %374  ;;  %s1225_s13 = scalar_lea.vmem [#allocation10], %s1171_s26 }
 0x194   : > { %701 = dma.vmem_to_hbm [thread:$0]  (%p1127_p0), %s1186_s25, 256, %s1192_s12, %s1196_s21, %s1002_s16, %s1002_s16, %s1009_s24  }
 0x195   : > { %659 = vst.msk [vmem:[%s1174_s9 + $0x4] sm:$0xf] %vm365_vm2, %v379_v16  ;;  %377 = vst.msk [vmem:[%s1225_s13] sm:$0xf] %vm365_vm2, %v375_v17  ;;  %s448_s6 = sshll.u32 %s1174_s9, 4  ;;  %s1240_s26 = scalar_lea.hbm %s1335_s3, %s1182_s7  ;;  %s1234_s6 = int_to_ptr.vmem [resolvable:$true] %s448_s6 }
 0x196   : > { %s482_s17 = sshll.u32 %s1225_s13, 4  ;;  %s424_s29 = scalar_lea.sflag [#allocation4], %s1155_s14  ;;  %s1273_s17 = int_to_ptr.vmem [resolvable:$true] %s482_s17 }
 0x197   : > { %v394_v18 = vpop.permute.xlu1 %393  ;;  %v389_v19 = vpop.permute.xlu0 %388  ;;  %s875_s8 = scalar_lea.vmem %s1234_s6, 256  ;;  %s1010_s1 = smov [#allocation7]  }
 0x198   : > { %662 = vst.msk [vmem:[%s1174_s9 + $0x8] sm:$0xf] %vm365_vm2, %v394_v18  ;;  %661 = vst.msk [vmem:[%s1225_s13 + $0x4] sm:$0xf] %vm365_vm2, %v389_v19  ;;  %p876_p8 = scmp.ne.s32.totalorder %s1234_s6, %s875_s8  ;;  %s879_s28 = sshll.u32 %s1010_s1, 4  ;;  %s880_s28 = int_to_ptr.vmem [resolvable:$false] %s879_s28 }
 0x199   : > { %s881_s10 = scalar_lea.vmem %s880_s28, 512  ;;  %p882_p5 = scmp.lt.s32.totalorder %s1234_s6, %s880_s28 }
 0x19a   : > { %p877_p12 = pnand %p876_p8, %p1127_p0  ;;  %p883_p7 = scmp.lt.s32.totalorder %s881_s10, %s875_s8 }
 0x19b   : > { %v409_v20 = vpop.permute.xlu1 %408  ;;  %v404_v21 = vpop.permute.xlu0 %403 }
 0x19c   : > { %665 = vst.msk [vmem:[%s1174_s9 + $0xc] sm:$0xf] %vm365_vm2, %v409_v20  ;;  %664 = vst.msk [vmem:[%s1225_s13 + $0x8] sm:$0xf] %vm365_vm2, %v404_v21  ;;  %p878_p3 = pneg %p877_p12  ;;  %p884_p2 = por %p883_p7, %p882_p5 }
 0x19e   : > { %p885_p6 = pnand %p884_p2, %p878_p3 }
 0x1a0   : > { %888 = shalt.err (!%p885_p6)
}
 0x1a1   : > { %s889_s9 = scalar_lea.hbm %s1240_s26, 256  ;;  %s893_s25 = scalar_lea.hbm %s1335_s3, 512 }
 0x1a2   : > { %p890_p9 = scmp.ne.s32.totalorder %s1240_s26, %s889_s9  ;;  %p894_p1 = scmp.lt.s32.totalorder %s1240_s26, %s1335_s3 }
 0x1a3   : > { %p895_p10 = scmp.lt.s32.totalorder %s893_s25, %s889_s9 }
 0x1a4   : > { %p891_p13 = pnand %p890_p9, %p1127_p0 }
 0x1a5   : > { %p896_p4 = por %p895_p10, %p894_p1 }
 0x1a6   : > { %p892_p11 = pneg %p891_p13 }
 0x1a8   : > { %p897_p8 = pnand %p896_p4, %p892_p11 }
 0x1aa   : > { %900 = shalt.err (!%p897_p8)
}
 0x1ab   : > { %700 = dma.vmem_to_hbm [thread:$0]  (%p1127_p0), %s1234_s6, 256, %s1240_s26, %s424_s29, %s1002_s16, %s1002_s16, %s1009_s24   ;;  %v419_v22 = vpop.permute.xlu0 %418 }
 0x1ac   : > { %s1279_s10 = scalar_lea.hbm %s1337_s5, %s1182_s7  ;;  %667 = vst.msk [vmem:[%s1225_s13 + $0xc] sm:$0xf] %vm365_vm2, %v419_v22  ;;  %s901_s9 = scalar_lea.vmem %s1273_s17, 256 }
 0x1ad   : > { %p902_p12 = scmp.ne.s32.totalorder %s1273_s17, %s901_s9  ;;  %s1011_s6 = smov [#allocation10]  }
 0x1ae   : > { %s905_s26 = sshll.u32 %s1011_s6, 4  ;;  %s906_s26 = int_to_ptr.vmem [resolvable:$false] %s905_s26 }
 0x1af   : > { %p903_p3 = pnand %p902_p12, %p1127_p0  ;;  %s907_s29 = scalar_lea.vmem %s906_s26, 512 }
 0x1b0   : > { %p908_p7 = scmp.lt.s32.totalorder %s1273_s17, %s906_s26  ;;  %p909_p2 = scmp.lt.s32.totalorder %s907_s29, %s901_s9 }
 0x1b1   : > { %p904_p5 = pneg %p903_p3 }
 0x1b2   : > { %p910_p6 = por %p909_p2, %p908_p7 }
 0x1b4   : > { %p911_p9 = pnand %p910_p6, %p904_p5 }
 0x1b6   : > { %914 = shalt.err (!%p911_p9)
}
 0x1b7   : > { %s915_s7 = scalar_lea.hbm %s1279_s10, 256  ;;  %s919_s11 = scalar_lea.hbm %s1337_s5, 512 }
 0x1b8   : > { %p916_p13 = scmp.ne.s32.totalorder %s1279_s10, %s915_s7  ;;  %p920_p10 = scmp.lt.s32.totalorder %s1279_s10, %s1337_s5 }
 0x1b9   : > { %p921_p4 = scmp.lt.s32.totalorder %s919_s11, %s915_s7 }
 0x1ba   : > { %p917_p11 = pnand %p916_p13, %p1127_p0 }
 0x1bb   : > { %p922_p8 = por %p921_p4, %p920_p10 }
 0x1bc   : > { %p918_p1 = pneg %p917_p11 }
 0x1be   : > { %p923_p12 = pnand %p922_p8, %p918_p1 }
 0x1c0   : > { %926 = shalt.err (!%p923_p12)
}
 0x1c1   : > { %702 = dma.vmem_to_hbm [thread:$0]  (%p1127_p0), %s1273_s17, 256, %s1279_s10, %s1196_s21, %s1002_s16, %s1002_s16, %s1009_s24  }
 0x1c2 PF: > { %s497_s1 = sand.u32 1, %s969_s18   ;;  %p1354_p3 = scmp.ne.s32.totalorder %s1343_s27, 0 }
 0x1c3   : > { %p1355_p5 = scmp.ge.s32.totalorder %s989_s23, 2  ;;  %s498_s8 = scalar_lea.sflag [#allocation4], %s497_s1 }
 0x1c5   : > { %p715_p7 = pnand %p1355_p5, %p1354_p3 }
 0x1c7   : > { %p716_p2 = pneg %p715_p7 }
 0x1c9   : > { %960 = dma.done.wait (%p716_p2), %s498_s8, 256  }
 0x1ca   : > { %962 = vsyncadd (%p716_p2), %s498_s8, 4294967040  ;;  %s1356_s15 = sadd.s32 4294967294, %s989_s23  }
 0x1cb   : > { %s506_s28 = sand.u32 1, %s1356_s15  }
 0x1cc   : > { %s507_s9 = scalar_lea.sflag [#allocation9], %s506_s28 }
 0x1cd   : > { %964 = dma.done.wait (%p716_p2), %s507_s9, 512  }
 0x1ce   : > { %966 = vsyncadd (%p716_p2), %s507_s9, 4294966784  ;;  %s26_s23 = sadd.s32 1, %s989_s23   ;;  %s1357_s27 = sld [smem:[#allocation15_spill]] }
 0x1cf   : > { %p23_p0 = scmp.ge.s32.totalorder %s26_s23, 4   ;;  %s1358_s18 = smov %s973_s19 }
 0x1d0   : > { %s1359_s19 = smov %s977_s20  ;;  %s1360_s20 = smov %s1136_s30 }
 0x1d1   : > { %s1361_s21 = smov %s985_s22  ;;  %25 = sbr.rel (!%p23_p0) target bundleno = 11 (0xb), region = 122 }
 0x1d4   : > { %s1362_s22 = smov %s1357_s27 }
 0x1d6   :  { %521 = vsyncpa [#allocation3], 1 }
 0x1d7   :  { %523 = vsyncpa [#allocation3 + $0x1], 1 }
 0x1d8   :  { %524 = vsyncpa [#allocation6], 1 }
 0x1d9   :  { %525 = vsyncpa [#allocation4], 1 }
 0x1da   :  { %527 = vsyncpa [#allocation4 + $0x1], 1 }
 0x1db   :  { %528 = vsyncpa [#allocation9], 1 }
 0x1dc   :  { %530 = vsyncpa [#allocation9 + $0x1], 1 }

</bundles_post_ra>
